<compile_context>
chip_gen: v7x
topology: tpu7x:2x2x1
jax: 0.10.0
libtpu: 0.0.40
codegen_flags: <defaults>
</compile_context>

<pallas_src>
import functools

import numpy as np
import jax
import jax.numpy as jnp
from jax.experimental import pallas as pl
from jax.experimental.pallas import tpu as pltpu

LANES = 128
TARGET_BLOCK_ELEMS = 1 << 20     # ~1M elems -> ~4 MiB f32 per input per grid step


def _cos_sim_kernel(f1_ref, f2_ref, out_ref, acc_ref, *,
                    r_tile, n_steps, total_blocks, d_true, eps, needs_mask):
    """One grid step: a (B, r_tile, 128) slab of both feature tensors.

    Cosine similarity is taken along dim=0 (the batch axis), matching
    nn.CosineSimilarity(dim=0, eps).  Per-step work is elementwise VPU math plus
    one rsqrt per column; per-column similarities fold into an (8, 128) full-vreg
    accumulator, and the final tiny reduce + scale happen in the wrapper.
    """
    p = pl.program_id(0)                       # parallel split of the column blocks
    j = pl.program_id(1)                       # sequential steps within the split

    @pl.when(j == 0)
    def _():
        acc_ref[...] = jnp.zeros_like(acc_ref)

    f1 = f1_ref[...].astype(jnp.float32)       # (B, r_tile, 128), in-register upcast
    f2 = f2_ref[...].astype(jnp.float32)

    # dim=0 (batch) reductions -> per-column stats, shape (r_tile, 128).
    dot = jnp.sum(f1 * f2, axis=0)
    n1 = jnp.sum(f1 * f1, axis=0)
    n2 = jnp.sum(f2 * f2, axis=0)

    # PyTorch cosine_similarity: dot / sqrt(max(n1*n2, eps^2)) == dot * rsqrt(...).
    eps2 = jnp.float32(eps) * jnp.float32(eps)
    sim = dot * jax.lax.rsqrt(jnp.maximum(n1 * n2, eps2))

    if needs_mask:
        # Mask (a) columns past the true feature count in an over-read edge block
        # (their VMEM contents are unspecified -> could be NaN/Inf) and (b) the
        # duplicate clamped block of an uneven parallel split.
        blk = p * n_steps + j                  # global column-block index
        row = jax.lax.broadcasted_iota(jnp.int32, (r_tile, LANES), 0)
        lane = jax.lax.broadcasted_iota(jnp.int32, (r_tile, LANES), 1)
        col = (blk * r_tile + row) * LANES + lane
        sim = jnp.where((col < d_true) & (blk < total_blocks), sim, 0.0)

    if r_tile % 8 == 0:
        # Full-vreg accumulation: pure VPU vreg adds, no per-step XLU reduce.
        acc_ref[...] += sim.reshape(-1, 8, LANES).sum(axis=0)
    else:
        # One-shot small-feature path (r_tile == full extent, single grid step).
        acc_ref[0:1, :] += jnp.sum(sim, axis=0, keepdims=True)

    @pl.when(j == pl.num_programs(1) - 1)
    def _():
        out_ref[...] = acc_ref[...]            # lane-dense (8, 128) partial store


def clip_cos_sim_img_loss(feat1, feat2, *, dim=0, eps=1e-8, loss_weight=0.5):
    """loss = loss_weight * mean(cosine_similarity(feat1, feat2, dim, eps))."""
    assert feat1.shape == feat2.shape, (feat1.shape, feat2.shape)

    # dim=0 (the module default) is free; other dims pay one transpose of both inputs.
    f1 = jnp.moveaxis(feat1, dim, 0)
    f2 = jnp.moveaxis(feat2, dim, 0)
    b = int(f1.shape[0])
    d_true = int(np.prod(f1.shape[1:])) if f1.ndim > 1 else 1
    f1 = f1.reshape(b, d_true)
    f2 = f2.reshape(b, d_true)

    # Lane-dense layout: (B, D) -> (B, D/128, 128).  Pad only to the next lane
    # multiple (no-op for CLIP feature widths); block-level over-read past r_total
    # is handled by the in-kernel mask instead of wrapper-side re-padding.
    d_lanes = -(-d_true // LANES) * LANES
    if d_lanes != d_true:
        f1 = jnp.pad(f1, ((0, 0), (0, d_lanes - d_true)))
        f2 = jnp.pad(f2, ((0, 0), (0, d_lanes - d_true)))
    r_total = d_lanes // LANES
    f1 = f1.reshape(b, r_total, LANES)          # contiguous row-major view, free
    f2 = f2.reshape(b, r_total, LANES)

    # Row-tile: biggest multiple of 8 keeping ~4 MiB f32 per input per block, or the
    # full extent for small features (one DMA per input, no loop).  NOTE: for a very
    # long reduction axis (huge B) the 8-row floor can exceed the VMEM budget; a
    # B-tiled variant accumulating dot/n1/n2 partials would be needed there.
    r_cap = max(8, (TARGET_BLOCK_ELEMS // (b * LANES)) // 8 * 8)
    r_tile = r_total if r_total <= r_cap else r_cap
    total_blocks = -(-r_total // r_tile)

    # Split column blocks across TensorCores (v7x has 2; harmless on 1-TC chips).
    n_par = 2 if total_blocks >= 2 else 1
    n_steps = -(-total_blocks // n_par)

    if n_par * n_steps == total_blocks:
        in_map = lambda p, j: (0, p * n_steps + j, 0)
    else:  # uneven split: clamp the trailing block index; the kernel masks the duplicate.
        in_map = lambda p, j: (0, jnp.minimum(p * n_steps + j, total_blocks - 1), 0)

    needs_mask = (total_blocks * r_tile != r_total) or (n_par * n_steps != total_blocks)

    itemsize = jnp.dtype(f1.dtype).itemsize
    block_in_bytes = b * r_tile * LANES * itemsize
    block_f32_bytes = b * r_tile * LANES * 4
    # 2 inputs x 2 pipeline buffers + f32 upcast / elementwise temporaries; clamped to
    # stay inside every generation's VMEM (v5e 128 MiB, v6e 128 MiB, v7x 64 MiB).
    vmem_limit = int(min(56 << 20,
                         max(32 << 20,
                             4 * block_in_bytes + 6 * block_f32_bytes + (2 << 20))))

    kernel = functools.partial(
        _cos_sim_kernel, r_tile=r_tile, n_steps=n_steps, total_blocks=total_blocks,
        d_true=d_true, eps=eps, needs_mask=needs_mask)

    in_spec = pl.BlockSpec((b, r_tile, LANES), in_map)
    partials = pl.pallas_call(
        kernel,
        out_shape=jax.ShapeDtypeStruct((n_par * 8, LANES), jnp.float32),
        grid_spec=pltpu.PrefetchScalarGridSpec(
            num_scalar_prefetch=0,
            grid=(n_par, n_steps),
            in_specs=[in_spec, in_spec],
            out_specs=pl.BlockSpec((8, LANES), lambda p, j: (p, 0)),
            scratch_shapes=[pltpu.VMEM((8, LANES), jnp.float32)],
        ),
        compiler_params=pltpu.CompilerParams(
            dimension_semantics=("parallel", "arbitrary"),
            vmem_limit_bytes=vmem_limit),
    )(f1, f2)

    # Tiny (n_par*8, 128) reduce + scale outside the kernel.
    return (jnp.float32(loss_weight) / jnp.float32(d_true)) * jnp.sum(partials)


def _reference(f1, f2, dim=0, eps=1e-8, loss_weight=0.5):
    f1 = f1.astype(jnp.float32)
    f2 = f2.astype(jnp.float32)
    dot = jnp.sum(f1 * f2, axis=dim)
    n1 = jnp.sum(f1 * f1, axis=dim)
    n2 = jnp.sum(f2 * f2, axis=dim)
    sim = dot / jnp.sqrt(jnp.maximum(n1 * n2, eps * eps))
    return loss_weight * jnp.mean(sim)


if __name__ == "__main__":
    key = jax.random.PRNGKey(0)
    k1, k2, k3, k4 = jax.random.split(key, 4)

    # 1) CLIP ViT-B/32 image features: (batch, 512) — the module's actual case.
    feat_shape = (2, 512)
    img_feat1 = jax.random.normal(k1, feat_shape, dtype=jnp.float32)
    img_feat2 = jax.random.normal(k2, feat_shape, dtype=jnp.float32)

    loss = jax.block_until_ready(clip_cos_sim_img_loss(img_feat1, img_feat2))
    ref = _reference(img_feat1, img_feat2)
    assert jnp.allclose(loss, ref, rtol=1e-5, atol=1e-6), (loss, ref)

    # 2) Larger, non-lane-aligned feature count: exercises the tiled path, the
    #    parallel split across column blocks and the in-kernel edge mask.
    big_shape = (64, 17000)
    g1 = jax.random.normal(k3, big_shape, dtype=jnp.float32)
    g2 = jax.random.normal(k4, big_shape, dtype=jnp.float32)

    loss2 = jax.block_until_ready(clip_cos_sim_img_loss(g1, g2))
    ref2 = _reference(g1, g2)
    assert jnp.allclose(loss2, ref2, rtol=1e-4, atol=1e-5), (loss2, ref2)

    print("KERNEL_OK")
</pallas_src>

<mosaic_0001>
module attributes {stable_mosaic.version = 11 : i64} {
  func.func @_cos_sim_kernel(%arg0: i32, %arg1: i32, %arg2: memref<2x4x128xf32, #tpu.memory_space<vmem>>, %arg3: memref<2x4x128xf32, #tpu.memory_space<vmem>>, %arg4: memref<8x128xf32, #tpu.memory_space<vmem>>, %arg5: memref<8x128xf32, #tpu.memory_space<vmem>>) attributes {dimension_semantics = [#tpu.dimension_semantics<parallel>, #tpu.dimension_semantics<arbitrary>], iteration_bounds = array<i64: 1, 1>, scalar_prefetch = 0 : i64, scratch_operands = 1 : i64, tpu.core_type = #tpu.core_type<tc>, window_params = [{transform_indices = @transform_0, window_bounds = array<i64: 2, 4, 128>}, {transform_indices = @transform_1, window_bounds = array<i64: 2, 4, 128>}, {transform_indices = @transform_2, window_bounds = array<i64: 8, 128>}]} {
    %c0_i32 = arith.constant 0 : i32
    %0 = arith.cmpi eq, %arg1, %c0_i32 : i32
    %1 = arith.extui %0 : i1 to i32
    %c0_i32_0 = arith.constant 0 : i32
    %2 = arith.cmpi ne, %1, %c0_i32_0 : i32
    scf.if %2 {
      %cst_17 = arith.constant 0.000000e+00 : f32
      %25 = vector.broadcast %cst_17 : f32 to vector<8x128xf32>
      %c0_18 = arith.constant 0 : index
      %c0_19 = arith.constant 0 : index
      %26 = vector.load %arg5[%c0_18, %c0_19] : memref<8x128xf32, #tpu.memory_space<vmem>>, vector<8x128xf32>
      tpu.vector_store %arg5[%c0_18, %c0_19], %25 {strides = array<i32>} : memref<8x128xf32, #tpu.memory_space<vmem>>, vector<8x128xf32>,
    } else {
    }
    %c0 = arith.constant 0 : index
    %c0_1 = arith.constant 0 : index
    %c0_2 = arith.constant 0 : index
    %3 = vector.load %arg2[%c0, %c0_1, %c0_2] : memref<2x4x128xf32, #tpu.memory_space<vmem>>, vector<2x4x128xf32>
    %c0_3 = arith.constant 0 : index
    %c0_4 = arith.constant 0 : index
    %c0_5 = arith.constant 0 : index
    %4 = vector.load %arg3[%c0_3, %c0_4, %c0_5] : memref<2x4x128xf32, #tpu.memory_space<vmem>>, vector<2x4x128xf32>
    %5 = arith.mulf %3, %4 : vector<2x4x128xf32>
    %cst = arith.constant dense<0.000000e+00> : vector<4x128xf32>
    %6 = vector.multi_reduction <add>, %5, %cst [0] : vector<2x4x128xf32> to vector<4x128xf32>
    %7 = arith.mulf %3, %3 : vector<2x4x128xf32>
    %cst_6 = arith.constant dense<0.000000e+00> : vector<4x128xf32>
    %8 = vector.multi_reduction <add>, %7, %cst_6 [0] : vector<2x4x128xf32> to vector<4x128xf32>
    %9 = arith.mulf %4, %4 : vector<2x4x128xf32>
    %cst_7 = arith.constant dense<0.000000e+00> : vector<4x128xf32>
    %10 = vector.multi_reduction <add>, %9, %cst_7 [0] : vector<2x4x128xf32> to vector<4x128xf32>
    %cst_8 = arith.constant 9.99999993E-9 : f32
    %cst_9 = arith.constant 9.99999993E-9 : f32
    %11 = arith.mulf %cst_8, %cst_9 : f32
    %12 = arith.mulf %8, %10 : vector<4x128xf32>
    %13 = vector.broadcast %11 : f32 to vector<4x128xf32>
    %14 = arith.maximumf %12, %13 : vector<4x128xf32>
    %15 = math.rsqrt %14 : vector<4x128xf32>
    %16 = arith.mulf %6, %15 : vector<4x128xf32>
    %c0_10 = arith.constant 0 : index
    %c0_11 = arith.constant 0 : index
    %17 = vector.load %arg5[%c0_10, %c0_11] : memref<8x128xf32, #tpu.memory_space<vmem>>, vector<1x128xf32>
    %cst_12 = arith.constant dense<0.000000e+00> : vector<128xf32>
    %18 = vector.multi_reduction <add>, %16, %cst_12 [0] : vector<4x128xf32> to vector<128xf32>
    %19 = vector.shape_cast %18 : vector<128xf32> to vector<1x128xf32>
    %20 = arith.addf %17, %19 : vector<1x128xf32>
    %c0_13 = arith.constant 0 : index
    %c0_14 = arith.constant 0 : index
    %21 = vector.load %arg5[%c0_13, %c0_14] : memref<8x128xf32, #tpu.memory_space<vmem>>, vector<1x128xf32>
    tpu.vector_store %arg5[%c0_13, %c0_14], %20 {strides = array<i32>} : memref<8x128xf32, #tpu.memory_space<vmem>>, vector<1x128xf32>,
    %c0_i32_15 = arith.constant 0 : i32
    %22 = arith.cmpi eq, %arg1, %c0_i32_15 : i32
    %23 = arith.extui %22 : i1 to i32
    %c0_i32_16 = arith.constant 0 : i32
    %24 = arith.cmpi ne, %23, %c0_i32_16 : i32
    scf.if %24 {
      %c0_17 = arith.constant 0 : index
      %c0_18 = arith.constant 0 : index
      %25 = vector.load %arg5[%c0_17, %c0_18] : memref<8x128xf32, #tpu.memory_space<vmem>>, vector<8x128xf32>
      %c0_19 = arith.constant 0 : index
      %c0_20 = arith.constant 0 : index
      %26 = vector.load %arg4[%c0_19, %c0_20] : memref<8x128xf32, #tpu.memory_space<vmem>>, vector<8x128xf32>
      tpu.vector_store %arg4[%c0_19, %c0_20], %25 {strides = array<i32>} : memref<8x128xf32, #tpu.memory_space<vmem>>, vector<8x128xf32>,
    } else {
    }
    return
  }
  func.func @transform_0(%arg0: i32, %arg1: i32) -> (i32, i32, i32) {
    %c1_i32 = arith.constant 1 : i32
    %0 = arith.muli %arg0, %c1_i32 : i32
    %1 = arith.addi %0, %arg1 : i32
    %c0_i32 = arith.constant 0 : i32
    %c0_i32_0 = arith.constant 0 : i32
    %c0_i32_1 = arith.constant 0 : i32
    return %c0_i32, %1, %c0_i32_0 : i32, i32, i32
  }
  func.func @transform_1(%arg0: i32, %arg1: i32) -> (i32, i32, i32) {
    %c1_i32 = arith.constant 1 : i32
    %0 = arith.muli %arg0, %c1_i32 : i32
    %1 = arith.addi %0, %arg1 : i32
    %c0_i32 = arith.constant 0 : i32
    %c0_i32_0 = arith.constant 0 : i32
    %c0_i32_1 = arith.constant 0 : i32
    return %c0_i32, %1, %c0_i32_0 : i32, i32, i32
  }
  func.func @transform_2(%arg0: i32, %arg1: i32) -> (i32, i32) {
    %c0_i32 = arith.constant 0 : i32
    %c0_i32_0 = arith.constant 0 : i32
    return %arg0, %c0_i32 : i32, i32
  }
}

</mosaic_0001>

<bundles_post_ra>
// kernel: tpu_custom_call.1
= control target key start
LH: loop header
LB: loop body
LE: loop exit
PB: predicated region body
PF: predicated region fallthrough
CT: control target
= control target key end

     0   :  { %7 = vsyncpa [#allocation4], 0  ;;  %s252_s0 = inlined_call_operand.hbm [shape: f32[2,4,128], index: 0, kind: input, shape index: {}]   ;;  %s253_s1 = inlined_call_operand.hbm [shape: f32[2,4,128], index: 1, kind: input, shape index: {}]   ;;  %s254_s2 = inlined_call_operand.hbm [shape: f32[8,128], index: 2, kind: output, shape index: {}]  }
   0x1   :  { %8 = vsyncpa [#allocation7], 0 }
   0x2   :  { %9 = vsyncpa [#allocation5], 0  ;;  %s188_s9 = smov [#allocation3]   ;;  %s116_s13 = scalar_lea.hbm %s252_s0, 128 }
   0x3   :  { %s18_s10 = sshll.u32 %s188_s9, 4  ;;  %p117_p0 = scmp.ne.s32.totalorder %s252_s0, %s116_s13  ;;  %s19_s10 = int_to_ptr.vmem [resolvable:$true] %s18_s10 }
   0x4   :  { %p120_p1 = scmp.lt.u32.totalorder %s116_s13, %s252_s0 }
   0x6   :  { %p122_p2 = pnand %p120_p1, %p117_p0 }
   0x8   :  { %125 = shalt.err (!%p122_p2)
}
   0x9   :  { %s126_s18 = scalar_lea.vmem %s19_s10, 128  ;;  %p131_p4 = scmp.lt.s32.totalorder %s19_s10, %s19_s10 }
   0xa   :  { %p127_p3 = scmp.ne.s32.totalorder %s19_s10, %s126_s18  ;;  %p132_p5 = scmp.lt.s32.totalorder %s126_s18, %s126_s18 }
   0xc   :  { %p133_p6 = por %p132_p5, %p131_p4 }
   0xe   :  { %p134_p7 = pnand %p133_p6, %p127_p3 }
  0x10   :  { %137 = shalt.err (!%p134_p7)
}
  0x11   :  { %s189_s19 = smov 64   ;;  %s190_s20 = smov 4  }
  0x12   :  { %24 = dma.hbm_to_vmem [thread:$0]  %s252_s0, 128, %s19_s10, [#allocation4], %s189_s19, %s189_s19, %s190_s20  }
  0x13   :  { %s191_s23 = smov [#allocation6]   ;;  %s138_s27 = scalar_lea.hbm %s253_s1, 128 }
  0x14   :  { %s33_s24 = sshll.u32 %s191_s23, 4  ;;  %p139_p8 = scmp.ne.s32.totalorder %s253_s1, %s138_s27  ;;  %s34_s24 = int_to_ptr.vmem [resolvable:$true] %s33_s24 }
  0x15   :  { %p142_p9 = scmp.lt.u32.totalorder %s138_s27, %s253_s1 }
  0x17   :  { %p144_p10 = pnand %p142_p9, %p139_p8 }
  0x19   :  { %147 = shalt.err (!%p144_p10)
}
  0x1a   :  { %s148_s4 = scalar_lea.vmem %s34_s24, 128  ;;  %p153_p12 = scmp.lt.s32.totalorder %s34_s24, %s34_s24 }
  0x1b   :  { %p149_p11 = scmp.ne.s32.totalorder %s34_s24, %s148_s4  ;;  %p154_p13 = scmp.lt.s32.totalorder %s148_s4, %s148_s4 }
  0x1d   :  { %p155_p0 = por %p154_p13, %p153_p12 }
  0x1f   :  { %p156_p1 = pnand %p155_p0, %p149_p11 }
  0x21   :  { %159 = shalt.err (!%p156_p1)
}
  0x22   :  { %39 = dma.hbm_to_vmem [thread:$0]  %s253_s1, 128, %s34_s24, [#allocation7], %s189_s19, %s189_s19, %s190_s20  }
  0x23   :  { %182 = dma.done.wait [#allocation4], 128  }
  0x24   :  { %183 = vsyncadd [#allocation4], 4294967168 }
  0x25   :  { %184 = dma.done.wait [#allocation7], 128  }
  0x26   :  { %185 = vsyncadd [#allocation7], 4294967168  ;;  %v192_v0 = vmov 0.0   ;;  %vm59_vm0 = vcmask 1043456   ;;  %v53_v1 = vld [vmem:[#allocation3] sm:$0xf] }
  0x27   :  { %52 = vst [vmem:[#allocation2] sm:$0xff] %v192_v0  ;;  %v54_v2 = vld [vmem:[#allocation3 + $0x4] sm:$0xf]  ;;  %v55_v3 = vld [vmem:[#allocation6] sm:$0xf]  ;;  %v63_v5 = vmul.f32 %v53_v1, %v53_v1  ;;  %s193_s1 = smov [#allocation8]  }
  0x28   :  { %v56_v4 = vld [vmem:[#allocation6 + $0x4] sm:$0xf]  ;;  %v64_v6 = vmul.f32 %v54_v2, %v54_v2  ;;  %v68_v7 = vmul.f32 %v55_v3, %v55_v3  ;;  %v57_v17 = vmul.f32 %v55_v3, %v53_v1  ;;  %s98_s6 = sshll.u32 %s193_s1, 4  ;;  %s99_s6 = int_to_ptr.vmem [resolvable:$true] %s98_s6 }
  0x29   :  { %v69_v8 = vmul.f32 %v56_v4, %v56_v4  ;;  %v65_v9 = vsel %vm59_vm0, %v63_v5, 0.0  ;;  %v58_v18 = vmul.f32 %v56_v4, %v54_v2  ;;  %s160_s7 = scalar_lea.vmem %s99_s6, 128  ;;  %p165_p3 = scmp.lt.s32.totalorder %s99_s6, %s99_s6 }
  0x2a   :  { %v66_v10 = vsel %vm59_vm0, %v64_v6, 0.0  ;;  %v70_v11 = vsel %vm59_vm0, %v68_v7, 0.0  ;;  %v60_v19 = vsel %vm59_vm0, %v57_v17, 0.0  ;;  %p161_p2 = scmp.ne.s32.totalorder %s99_s6, %s160_s7  ;;  %p166_p4 = scmp.lt.s32.totalorder %s160_s7, %s160_s7 }
  0x2b   :  { %v67_v12 = vadd.f32 %v66_v10, %v65_v9  ;;  %v71_v13 = vsel %vm59_vm0, %v69_v8, 0.0  ;;  %v61_v20 = vsel %vm59_vm0, %v58_v18, 0.0 }
  0x2c   :  { %v72_v14 = vadd.f32 %v71_v13, %v70_v11  ;;  %v62_v21 = vadd.f32 %v61_v20, %v60_v19  ;;  %p167_p5 = por %p166_p4, %p165_p3 }
  0x2e   :  { %v73_v15 = vmul.f32 %v72_v14, %v67_v12  ;;  %v77_v30 = vld [vmem:[#allocation2] sm:$0x1]  ;;  %p168_p6 = pnand %p167_p5, %p161_p2 }
  0x30   :  { %v74_v16 = vmax.f32 %v73_v15, 1e-16 }
  0x32   :  { %114 = vrsqrt.f32 %v74_v16 }
  0x3c   :  { %v115_v22 = vpop.eup %114 }
  0x3d   :  { %v76_v23 = vmul.f32 %v115_v22, %v62_v21 }
  0x3f   :  { %v78_v24 = vsel %vm59_vm0, %v76_v23, 0.0 }
  0x40   :  { %v79_v25 = vrot.slane %v78_v24, 4 }
  0x42   :  { %v80_v26 = vadd.f32 %v79_v25, %v78_v24 }
  0x44   :  { %v81_v27 = vrot.slane %v80_v26, 2 }
  0x46   :  { %v82_v28 = vadd.f32 %v81_v27, %v80_v26 }
  0x48   :  { %v83_v29 = vrot.slane %v82_v28, 1 }
  0x4a   :  { %v84_v31 = vadd.f32 %v83_v29, %v82_v28 }
  0x4c   :  { %v85_v32 = vadd.f32 %v84_v31, %v77_v30 }
  0x4e   :  { %86 = vst [vmem:[#allocation2] sm:$0x1] %v85_v32 }
  0x55   :  { %v90_v33 = vld [vmem:[#allocation2] sm:$0xff] }
  0x56   :  { %91 = vst [vmem:[#allocation8] sm:$0xff] %v90_v33 }
  0x57   :  { %171 = shalt.err (!%p168_p6)
}
  0x58   :  { %s172_s10 = scalar_lea.hbm %s254_s2, 128 }
  0x59   :  { %p173_p7 = scmp.ne.s32.totalorder %s254_s2, %s172_s10  ;;  %p176_p8 = scmp.lt.u32.totalorder %s172_s10, %s254_s2 }
  0x5b   :  { %p178_p9 = pnand %p176_p8, %p173_p7 }
  0x5d   :  { %181 = shalt.err (!%p178_p9)
}
  0x5e   :  { %101 = dma.vmem_to_hbm [thread:$0]  %s99_s6, 128, %s254_s2, [#allocation5]  }
  0x5f   :  { %186 = dma.done.wait [#allocation5], 128  }
  0x60   :  { %187 = vsyncadd [#allocation5], 4294967168 }
  0x61   :  { %105 = vsyncpa [#allocation4], 1 }
  0x62   :  { %106 = vsyncpa [#allocation7], 1 }
  0x63   :  { %107 = vsyncpa [#allocation5], 1 }

</bundles_post_ra>
